<compile_context>
chip_gen: v6e
topology: v6e:2x2x1
jax: 0.10.0
libtpu: 0.0.40
codegen_flags: <defaults>
</compile_context>

<pallas_src>
import functools

import jax
import jax.numpy as jnp
from jax.experimental import pallas as pl
from jax.experimental.pallas import tpu as pltpu

_LANE = 512        # lane-dense last dim (multiple of 128)
_BLOCK_ROWS = 512  # 512 x 512 f32 = 1 MiB per input block
_NUM_CORES = 2     # "parallel" core axis (v7x megacore); harmless elsewhere


def _cdiv(a, b):
    return (a + b - 1) // b


def _round_up(a, m):
    return _cdiv(a, m) * m


def _mse_kernel(pred_ref, tgt_ref, out_ref, acc_ref):
    """Accumulate per-core partial sums of (pred - target)^2.

    acc_ref is a vreg-shaped (8, _LANE) f32 accumulator: the per-step block
    reduction folds rows onto 8 sublanes with pure VPU adds (no XLU, no
    scalar dependency chain).  The final full reduce happens in the wrapper.
    """
    i = pl.program_id(1)

    @pl.when(i == 0)
    def _():
        acc_ref[...] = jnp.zeros_like(acc_ref)

    diff = pred_ref[...].astype(jnp.float32) - tgt_ref[...].astype(jnp.float32)
    sq = diff * diff
    rows, lanes = sq.shape
    # (rows, L) -> (rows//8, 8, L) summed over the leading axis: elementwise
    # vreg adds along native (8, 128) tile boundaries.
    acc_ref[...] += jnp.sum(sq.reshape(rows // 8, 8, lanes), axis=0)

    @pl.when(i == pl.num_programs(1) - 1)
    def _():
        out_ref[...] = acc_ref[...]  # lane-dense, unmasked store


@functools.partial(jax.jit, static_argnames=("reduction",))
def mse_loss(pred: jax.Array, target: jax.Array, reduction: str = "mean") -> jax.Array:
    """MSE loss (reduction 'mean' or 'sum') computed in a Pallas TPU kernel."""
    assert pred.shape == target.shape, "pred/target shape mismatch"
    n_elems = int(pred.size)

    # Flatten to a lane-dense 2-D slab; zero-pad the tail (zeros contribute 0
    # to the sum of squared differences, so no masking is needed).
    p = pred.reshape(-1)
    t = target.reshape(-1)

    rows_raw = _cdiv(n_elems, _LANE)
    rows_per_core = _cdiv(rows_raw, _NUM_CORES)
    block_rows = min(_BLOCK_ROWS, _round_up(rows_per_core, 8))
    blocks_per_core = _cdiv(rows_per_core, block_rows)
    rows_padded = _NUM_CORES * blocks_per_core * block_rows
    padded_elems = rows_padded * _LANE

    pad = padded_elems - n_elems
    if pad:
        p = jnp.pad(p, (0, pad))
        t = jnp.pad(t, (0, pad))
    p2 = p.reshape(rows_padded, _LANE)
    t2 = t.reshape(rows_padded, _LANE)

    in_spec = pl.BlockSpec(
        (block_rows, _LANE),
        lambda c, i: (c * blocks_per_core + i, 0),
    )

    partials = pl.pallas_call(
        _mse_kernel,
        out_shape=jax.ShapeDtypeStruct((_NUM_CORES * 8, _LANE), jnp.float32),
        grid_spec=pltpu.PrefetchScalarGridSpec(
            num_scalar_prefetch=0,
            grid=(_NUM_CORES, blocks_per_core),
            in_specs=[in_spec, in_spec],
            out_specs=pl.BlockSpec((8, _LANE), lambda c, i: (c, 0)),
            scratch_shapes=[pltpu.VMEM((8, _LANE), jnp.float32)],
        ),
        compiler_params=pltpu.CompilerParams(
            dimension_semantics=("parallel", "arbitrary"),
        ),
    )(p2, t2)

    total = jnp.sum(partials)  # tiny (2*8*512) reduce + divide: cheap XLA glue
    if reduction == "sum":
        return total
    if reduction == "mean":
        return total / jnp.float32(n_elems)
    # TODO(synk): reduction='none' (elementwise output) not implemented in the Pallas path.
    raise ValueError(f"unsupported reduction: {reduction!r}")


class MSELoss:
    """Mirror of the PyTorch module's forward signature / return dict."""

    def __init__(self, reduction="mean"):
        self.reduction = reduction

    def __call__(self, pred, target, edge_index=None, edge_attr=None, mask=None):
        loss = mse_loss(pred, target, reduction=self.reduction)
        # 'MSE loss' mirrors torch's loss.item() (host Python float).
        return {"loss": loss, "MSE loss": float(loss)}


if __name__ == "__main__":
    key = jax.random.PRNGKey(0)
    k1, k2 = jax.random.split(key)
    # small graph-style shapes: 256 nodes x 32 features
    pred = jax.random.normal(k1, (256, 32), dtype=jnp.float32)
    target = jax.random.normal(k2, (256, 32), dtype=jnp.float32)

    loss_mod = MSELoss(reduction="mean")
    out = loss_mod(pred, target)
    jax.block_until_ready(out["loss"])

    # correctness check against plain JAX reference (f32 inputs)
    ref = jnp.mean((pred - target) ** 2)
    assert jnp.allclose(out["loss"], ref, rtol=1e-5, atol=1e-6), (out["loss"], ref)

    # bf16 inputs stream through in their native dtype (upcast in-kernel)
    pred_bf = pred.astype(jnp.bfloat16)
    tgt_bf = target.astype(jnp.bfloat16)
    loss_bf = mse_loss(pred_bf, tgt_bf)
    jax.block_until_ready(loss_bf)
    ref_bf = jnp.mean(
        (pred_bf.astype(jnp.float32) - tgt_bf.astype(jnp.float32)) ** 2
    )
    assert jnp.allclose(loss_bf, ref_bf, rtol=1e-4, atol=1e-5), (loss_bf, ref_bf)

    print("KERNEL_OK")
</pallas_src>

<mosaic_0001>
module attributes {stable_mosaic.version = 11 : i64} {
  func.func @_mse_kernel(%arg0: i32, %arg1: i32, %arg2: memref<8x512xf32, #tpu.memory_space<vmem>>, %arg3: memref<8x512xf32, #tpu.memory_space<vmem>>, %arg4: memref<8x512xf32, #tpu.memory_space<vmem>>, %arg5: memref<8x512xf32, #tpu.memory_space<vmem>>) attributes {dimension_semantics = [#tpu.dimension_semantics<parallel>, #tpu.dimension_semantics<arbitrary>], iteration_bounds = array<i64: 2, 1>, scalar_prefetch = 0 : i64, scratch_operands = 1 : i64, tpu.core_type = #tpu.core_type<tc>, window_params = [{transform_indices = @transform_0, window_bounds = array<i64: 8, 512>}, {transform_indices = @transform_1, window_bounds = array<i64: 8, 512>}, {transform_indices = @transform_2, window_bounds = array<i64: 8, 512>}]} {
    %c0_i32 = arith.constant 0 : i32
    %0 = arith.cmpi eq, %arg1, %c0_i32 : i32
    %1 = arith.extui %0 : i1 to i32
    %c0_i32_0 = arith.constant 0 : i32
    %2 = arith.cmpi ne, %1, %c0_i32_0 : i32
    scf.if %2 {
      %cst_10 = arith.constant 0.000000e+00 : f32
      %15 = vector.broadcast %cst_10 : f32 to vector<8x512xf32>
      %c0_11 = arith.constant 0 : index
      %c0_12 = arith.constant 0 : index
      %16 = vector.load %arg5[%c0_11, %c0_12] : memref<8x512xf32, #tpu.memory_space<vmem>>, vector<8x512xf32>
      tpu.vector_store %arg5[%c0_11, %c0_12], %15 {strides = array<i32>} : memref<8x512xf32, #tpu.memory_space<vmem>>, vector<8x512xf32>,
    } else {
    }
    %c0 = arith.constant 0 : index
    %c0_1 = arith.constant 0 : index
    %3 = vector.load %arg2[%c0, %c0_1] : memref<8x512xf32, #tpu.memory_space<vmem>>, vector<8x512xf32>
    %c0_2 = arith.constant 0 : index
    %c0_3 = arith.constant 0 : index
    %4 = vector.load %arg3[%c0_2, %c0_3] : memref<8x512xf32, #tpu.memory_space<vmem>>, vector<8x512xf32>
    %5 = arith.subf %3, %4 : vector<8x512xf32>
    %6 = arith.mulf %5, %5 : vector<8x512xf32>
    %c0_4 = arith.constant 0 : index
    %c0_5 = arith.constant 0 : index
    %7 = vector.load %arg5[%c0_4, %c0_5] : memref<8x512xf32, #tpu.memory_space<vmem>>, vector<8x512xf32>
    %8 = vector.shape_cast %6 : vector<8x512xf32> to vector<1x8x512xf32>
    %cst = arith.constant dense<0.000000e+00> : vector<8x512xf32>
    %9 = vector.multi_reduction <add>, %8, %cst [0] : vector<1x8x512xf32> to vector<8x512xf32>
    %10 = arith.addf %7, %9 : vector<8x512xf32>
    %c0_6 = arith.constant 0 : index
    %c0_7 = arith.constant 0 : index
    %11 = vector.load %arg5[%c0_6, %c0_7] : memref<8x512xf32, #tpu.memory_space<vmem>>, vector<8x512xf32>
    tpu.vector_store %arg5[%c0_6, %c0_7], %10 {strides = array<i32>} : memref<8x512xf32, #tpu.memory_space<vmem>>, vector<8x512xf32>,
    %c0_i32_8 = arith.constant 0 : i32
    %12 = arith.cmpi eq, %arg1, %c0_i32_8 : i32
    %13 = arith.extui %12 : i1 to i32
    %c0_i32_9 = arith.constant 0 : i32
    %14 = arith.cmpi ne, %13, %c0_i32_9 : i32
    scf.if %14 {
      %c0_10 = arith.constant 0 : index
      %c0_11 = arith.constant 0 : index
      %15 = vector.load %arg5[%c0_10, %c0_11] : memref<8x512xf32, #tpu.memory_space<vmem>>, vector<8x512xf32>
      %c0_12 = arith.constant 0 : index
      %c0_13 = arith.constant 0 : index
      %16 = vector.load %arg4[%c0_12, %c0_13] : memref<8x512xf32, #tpu.memory_space<vmem>>, vector<8x512xf32>
      tpu.vector_store %arg4[%c0_12, %c0_13], %15 {strides = array<i32>} : memref<8x512xf32, #tpu.memory_space<vmem>>, vector<8x512xf32>,
    } else {
    }
    return
  }
  func.func @transform_0(%arg0: i32, %arg1: i32) -> (i32, i32) {
    %c1_i32 = arith.constant 1 : i32
    %0 = arith.muli %arg0, %c1_i32 : i32
    %1 = arith.addi %0, %arg1 : i32
    %c0_i32 = arith.constant 0 : i32
    %c0_i32_0 = arith.constant 0 : i32
    return %1, %c0_i32 : i32, i32
  }
  func.func @transform_1(%arg0: i32, %arg1: i32) -> (i32, i32) {
    %c1_i32 = arith.constant 1 : i32
    %0 = arith.muli %arg0, %c1_i32 : i32
    %1 = arith.addi %0, %arg1 : i32
    %c0_i32 = arith.constant 0 : i32
    %c0_i32_0 = arith.constant 0 : i32
    return %1, %c0_i32 : i32, i32
  }
  func.func @transform_2(%arg0: i32, %arg1: i32) -> (i32, i32) {
    %c0_i32 = arith.constant 0 : i32
    %c0_i32_0 = arith.constant 0 : i32
    return %arg0, %c0_i32 : i32, i32
  }
}

</mosaic_0001>

<bundles_post_ra>
// kernel: mse_loss.1
= control target key start
LH: loop header
LB: loop body
LE: loop exit
PB: predicated region body
PF: predicated region fallthrough
CT: control target
= control target key end

     0   :  { %s395_s9 = smov 0   ;;  %s397_s10 = smov 0   ;;  %s431_s0 = inlined_call_operand.vmem [shape: f32[16,512], index: 0, kind: input, shape index: {}]   ;;  %s432_s1 = inlined_call_operand.vmem [shape: f32[16,512], index: 1, kind: input, shape index: {}]   ;;  %s433_s2 = inlined_call_operand.vmem [shape: f32[16,512], index: 2, kind: output, shape index: {}]  }
   0x1   :  { %s399_s11 = smov 0  }
   0x2 LB: > { %s24_s12 = sadd.s32 1, %s374_s10  ;;  %p320_p0 = scmp.ge.s32.totalorder %s378_s11, 1  ;;  %s378_s11 = sphi %s399_s11, %s12_s11   ;;  %s374_s10 = sphi %s397_s10, %s435_s10   ;;  %s370_s9 = sphi %s395_s9, %s434_s9  }
   0x3   : > { %p26_p1 = scmp.ge.s32.totalorder %s24_s12, 2  ;;  %p142_p2 = scmp.lt.s32.totalorder %s378_s11, 3 }
   0x5   : > { %s437_s12 = smov (%p26_p1, %s24_s12), 0  ;;  %p143_p3 = pnand %p320_p0, %p142_p2 }
   0x6   : > { %p172_p4 = scmp.lt.s32.totalorder (!%p143_p3), %s370_s9, 1 }
   0x7   : > { %146 = sbr.rel (%p143_p3) target bundleno = 24 (0x18), region = 28 }
   0xc   : > { %s439_s9 = smov (!%p172_p4, %s370_s9), 1 }
   0xd   : > { %s329_s13 = sshll.u32 %s439_s9, 5 }
   0xe   : > { %s176_s16 = scalar_lea.vmem %s431_s0, %s329_s13  ;;  %s183_s19 = scalar_lea.vmem %s432_s1, %s329_s13 }
   0xf   : > { %v198_v0 = vld [vmem:[%s176_s16] sm:$0xff]  ;;  %v199_v2 = vld [vmem:[%s176_s16 + $0x8] sm:$0xff]  ;;  %v200_v5 = vld [vmem:[%s176_s16 + $0x10] sm:$0xff]  ;;  %s189_s22 = scalar_lea.vmem %s433_s2, %s329_s13 }
  0x10   : > { %v202_v1 = vld [vmem:[%s183_s19] sm:$0xff]  ;;  %v203_v4 = vld [vmem:[%s183_s19 + $0x8] sm:$0xff]  ;;  %v204_v6 = vld [vmem:[%s183_s19 + $0x10] sm:$0xff] }
  0x11   : > { %v206_v3 = vsub.f32 %v198_v0, %v202_v1  ;;  %v207_v7 = vsub.f32 %v199_v2, %v203_v4  ;;  %v208_v8 = vsub.f32 %v200_v5, %v204_v6  ;;  %v201_v9 = vld [vmem:[%s176_s16 + $0x18] sm:$0xff] }
  0x12   : > { %v205_v10 = vld [vmem:[%s183_s19 + $0x18] sm:$0xff] }
  0x13   : > { %v210_v11 = vmul.f32 %v206_v3, %v206_v3  ;;  %v209_v12 = vsub.f32 %v201_v9, %v205_v10  ;;  %v211_v13 = vmul.f32 %v207_v7, %v207_v7  ;;  %v212_v14 = vmul.f32 %v208_v8, %v208_v8 }
  0x15   : > { %237 = vst [vmem:[%s189_s22] sm:$0xff] %v210_v11  ;;  %v213_v15 = vmul.f32 %v209_v12, %v209_v12  ;;  %238 = vst [vmem:[%s189_s22 + $0x8] sm:$0xff] %v211_v13 }
  0x16   : > { %239 = vst [vmem:[%s189_s22 + $0x10] sm:$0xff] %v212_v14 }
  0x17   : > { %240 = vst [vmem:[%s189_s22 + $0x18] sm:$0xff] %v213_v15 }
  0x18 PF: > { %s12_s11 = sadd.s32 1, %s378_s11   ;;  %s434_s9 = smov %s374_s10 }
  0x19   : > { %p9_p5 = scmp.ge.s32.totalorder %s12_s11, 4   ;;  %s435_s10 = smov %s437_s12 }
  0x1b   :  { %11 = sbr.rel (!%p9_p5) target bundleno = 2 (0x2), region = 69 }

</bundles_post_ra>
